<compile_context>
chip_gen: v7x
topology: tpu7x:2x2x1
jax: 0.10.0
libtpu: 0.0.40
codegen_flags: <defaults>
</compile_context>

<pallas_src>
import math

import jax
import jax.numpy as jnp
from jax.experimental import pallas as pl
from jax.experimental.pallas import tpu as pltpu

LATENT_DIM = 256
HIDDEN = [128, 64, 32, 64, 128]
LAYER_DIMS = [LATENT_DIM] + HIDDEN + [LATENT_DIM]   # 256,128,64,32,64,128,256
LANE = 128


def _round_up(n, m):
    return ((n + m - 1) // m) * m


def scorenet_kernel(x_ref,
                    w1, b1, w2, b2, w3, b3, w4, b4, w5, b5, w6, b6,
                    o_ref):
    """Whole 6-layer MLP on one batch tile. Matmuls in bf16 on the MXU with fp32
    accumulation; bias add + tanh in fp32 (portable to v5e's fp32-only VPU/EUP)."""
    h = x_ref[...].astype(jnp.float32)

    def layer(h, w_ref, b_ref, activate):
        acc = jnp.dot(h.astype(jnp.bfloat16), w_ref[...],
                      preferred_element_type=jnp.float32) + b_ref[...]
        return jnp.tanh(acc) if activate else acc

    h = layer(h, w1, b1, True)
    h = layer(h, w2, b2, True)
    h = layer(h, w3, b3, True)
    h = layer(h, w4, b4, True)
    h = layer(h, w5, b5, True)
    h = layer(h, w6, b6, False)
    o_ref[...] = h.astype(o_ref.dtype)


def init_params(key, dims):
    """PyTorch-style nn.Linear init: U(-1/sqrt(fan_in), 1/sqrt(fan_in)).
    Returned in logical (unpadded) fp32 shapes: W [in, out], b [1, out]."""
    params = []
    for i in range(len(dims) - 1):
        fan_in, fan_out = dims[i], dims[i + 1]
        bound = 1.0 / math.sqrt(fan_in)
        key, kw, kb = jax.random.split(key, 3)
        w = jax.random.uniform(kw, (fan_in, fan_out), jnp.float32, -bound, bound)
        b = jax.random.uniform(kb, (1, fan_out), jnp.float32, -bound, bound)
        params.append((w, b))
    return params


def pad_params(params):
    """Zero-pad every weight/bias so all feature dims are multiples of 128 (lane-
    dense), and cast weights to bf16 (MXU-native input). Numerically exact:
    padded biases are zero, tanh(0)=0, and padded weight rows are zero."""
    padded = []
    for (w, b) in params:
        fi, fo = w.shape
        fi_p, fo_p = _round_up(fi, LANE), _round_up(fo, LANE)
        wp = jnp.zeros((fi_p, fo_p), jnp.float32).at[:fi, :fo].set(w)
        bp = jnp.zeros((1, fo_p), jnp.float32).at[:, :fo].set(b)
        padded.append((wp.astype(jnp.bfloat16), bp))
    return padded


def scorenet_forward(x, params, *, block_batch=512):
    """x: [B, 256] float32 -> scores: [B, 256] float32.

    block_batch is the per-grid-step row tile (multiple of 8). 256-1024 keeps the
    MXU full while staying far under VMEM limits on v5e/v6e/v7x; it is shrunk
    automatically for small batches and B is padded up to a multiple of it so any
    batch size is accepted.
    """
    B, D = x.shape
    assert D == LATENT_DIM
    assert block_batch % 8 == 0 and block_batch > 0

    # Don't compute hundreds of padded rows for tiny batches.
    block_batch = min(block_batch, _round_up(B, 8))

    padded_params = pad_params(params)

    num_blocks = pl.cdiv(B, block_batch)
    B_pad = num_blocks * block_batch
    x_p = jnp.pad(x, ((0, B_pad - B), (0, 0))) if B_pad != B else x

    flat_params = []
    in_specs = [pl.BlockSpec((block_batch, D), lambda i: (i, 0))]
    for (w, b) in padded_params:
        flat_params.extend([w, b])
        # Weights/biases are tiny: full-array blocks with constant index_map so
        # they are DMA'd once and stay VMEM-resident across all grid steps.
        in_specs.append(pl.BlockSpec(w.shape, lambda i: (0, 0)))
        in_specs.append(pl.BlockSpec(b.shape, lambda i: (0, 0)))

    out_spec = pl.BlockSpec((block_batch, D), lambda i: (i, 0))

    out = pl.pallas_call(
        scorenet_kernel,
        out_shape=jax.ShapeDtypeStruct((B_pad, D), x.dtype),
        grid_spec=pltpu.PrefetchScalarGridSpec(
            num_scalar_prefetch=0,
            grid=(num_blocks,),
            in_specs=in_specs,
            out_specs=out_spec,
        ),
        compiler_params=pltpu.CompilerParams(
            dimension_semantics=("parallel",)),
    )(x_p, *flat_params)

    return out[:B] if B_pad != B else out


def scorenet_reference(x, params):
    """Pure-JAX fp32 reference matching the PyTorch module."""
    h = x
    for i, (w, b) in enumerate(params):
        h = h @ w + b
        if i < len(params) - 1:
            h = jnp.tanh(h)
    return h


if __name__ == "__main__":
    key = jax.random.PRNGKey(0)
    k_params, k_x = jax.random.split(key)

    params = init_params(k_params, LAYER_DIMS)

    # Small toy batch (not a multiple of the tile, to exercise tail padding).
    batch = 10
    x = jax.random.normal(k_x, (batch, LATENT_DIM), jnp.float32)

    scores = scorenet_forward(x, params)
    scores = jax.block_until_ready(scores)

    # Sanity-check against a pure-JAX fp32 reference. Tolerance reflects bf16
    # matmul operands (fp32 accumulation) across 6 layers.
    ref = scorenet_reference(x, params)
    assert scores.shape == (batch, LATENT_DIM)
    assert jnp.allclose(scores, ref, atol=3e-2, rtol=3e-2), (
        float(jnp.max(jnp.abs(scores - ref))))

    print("KERNEL_OK")
</pallas_src>

<mosaic_0001>
module attributes {stable_mosaic.version = 11 : i64} {
  func.func @scorenet_kernel(%arg0: i32, %arg1: memref<16x256xf32, #tpu.memory_space<vmem>>, %arg2: memref<256x128xbf16, #tpu.memory_space<vmem>>, %arg3: memref<1x128xf32, #tpu.memory_space<vmem>>, %arg4: memref<128x128xbf16, #tpu.memory_space<vmem>>, %arg5: memref<1x128xf32, #tpu.memory_space<vmem>>, %arg6: memref<128x128xbf16, #tpu.memory_space<vmem>>, %arg7: memref<1x128xf32, #tpu.memory_space<vmem>>, %arg8: memref<128x128xbf16, #tpu.memory_space<vmem>>, %arg9: memref<1x128xf32, #tpu.memory_space<vmem>>, %arg10: memref<128x128xbf16, #tpu.memory_space<vmem>>, %arg11: memref<1x128xf32, #tpu.memory_space<vmem>>, %arg12: memref<128x256xbf16, #tpu.memory_space<vmem>>, %arg13: memref<1x256xf32, #tpu.memory_space<vmem>>, %arg14: memref<16x256xf32, #tpu.memory_space<vmem>>) attributes {dimension_semantics = [#tpu.dimension_semantics<parallel>], iteration_bounds = array<i64: 1>, scalar_prefetch = 0 : i64, scratch_operands = 0 : i64, tpu.core_type = #tpu.core_type<tc>, window_params = [{transform_indices = @transform_0, window_bounds = array<i64: 16, 256>}, {pipeline_mode = #tpu.pipeline_mode<synchronous>, transform_indices = @transform_1, window_bounds = array<i64: 256, 128>}, {pipeline_mode = #tpu.pipeline_mode<synchronous>, transform_indices = @transform_2, window_bounds = array<i64: 1, 128>}, {pipeline_mode = #tpu.pipeline_mode<synchronous>, transform_indices = @transform_3, window_bounds = array<i64: 128, 128>}, {pipeline_mode = #tpu.pipeline_mode<synchronous>, transform_indices = @transform_4, window_bounds = array<i64: 1, 128>}, {pipeline_mode = #tpu.pipeline_mode<synchronous>, transform_indices = @transform_5, window_bounds = array<i64: 128, 128>}, {pipeline_mode = #tpu.pipeline_mode<synchronous>, transform_indices = @transform_6, window_bounds = array<i64: 1, 128>}, {pipeline_mode = #tpu.pipeline_mode<synchronous>, transform_indices = @transform_7, window_bounds = array<i64: 128, 128>}, {pipeline_mode = #tpu.pipeline_mode<synchronous>, transform_indices = @transform_8, window_bounds = array<i64: 1, 128>}, {pipeline_mode = #tpu.pipeline_mode<synchronous>, transform_indices = @transform_9, window_bounds = array<i64: 128, 128>}, {pipeline_mode = #tpu.pipeline_mode<synchronous>, transform_indices = @transform_10, window_bounds = array<i64: 1, 128>}, {pipeline_mode = #tpu.pipeline_mode<synchronous>, transform_indices = @transform_11, window_bounds = array<i64: 128, 256>}, {pipeline_mode = #tpu.pipeline_mode<synchronous>, transform_indices = @transform_12, window_bounds = array<i64: 1, 256>}, {transform_indices = @transform_13, window_bounds = array<i64: 16, 256>}]} {
    %c0 = arith.constant 0 : index
    %c0_0 = arith.constant 0 : index
    %0 = vector.load %arg1[%c0, %c0_0] : memref<16x256xf32, #tpu.memory_space<vmem>>, vector<16x256xf32>
    %1 = arith.truncf %0 : vector<16x256xf32> to vector<16x256xbf16>
    %c0_1 = arith.constant 0 : index
    %c0_2 = arith.constant 0 : index
    %2 = vector.load %arg2[%c0_1, %c0_2] : memref<256x128xbf16, #tpu.memory_space<vmem>>, vector<256x128xbf16>
    %cst = arith.constant dense<0.000000e+00> : vector<16x128xf32>
    %3 = tpu.matmul %1, %2, %cst {dimension_numbers = #tpu.dot_dimension_numbers<[1], [0], [0], [1], [0, 0, 1, 1], [], []>} : vector<16x256xbf16>, vector<256x128xbf16>, vector<16x128xf32> -> vector<16x128xf32>
    %c0_3 = arith.constant 0 : index
    %c0_4 = arith.constant 0 : index
    %4 = vector.load %arg3[%c0_3, %c0_4] : memref<1x128xf32, #tpu.memory_space<vmem>>, vector<1x128xf32>
    %5 = vector.broadcast %4 : vector<1x128xf32> to vector<16x128xf32>
    %6 = arith.addf %3, %5 : vector<16x128xf32>
    %7 = math.tanh %6 : vector<16x128xf32>
    %8 = arith.truncf %7 : vector<16x128xf32> to vector<16x128xbf16>
    %c0_5 = arith.constant 0 : index
    %c0_6 = arith.constant 0 : index
    %9 = vector.load %arg4[%c0_5, %c0_6] : memref<128x128xbf16, #tpu.memory_space<vmem>>, vector<128x128xbf16>
    %cst_7 = arith.constant dense<0.000000e+00> : vector<16x128xf32>
    %10 = tpu.matmul %8, %9, %cst_7 {dimension_numbers = #tpu.dot_dimension_numbers<[1], [0], [0], [1], [0, 0, 1, 1], [], []>} : vector<16x128xbf16>, vector<128x128xbf16>, vector<16x128xf32> -> vector<16x128xf32>
    %c0_8 = arith.constant 0 : index
    %c0_9 = arith.constant 0 : index
    %11 = vector.load %arg5[%c0_8, %c0_9] : memref<1x128xf32, #tpu.memory_space<vmem>>, vector<1x128xf32>
    %12 = vector.broadcast %11 : vector<1x128xf32> to vector<16x128xf32>
    %13 = arith.addf %10, %12 : vector<16x128xf32>
    %14 = math.tanh %13 : vector<16x128xf32>
    %15 = arith.truncf %14 : vector<16x128xf32> to vector<16x128xbf16>
    %c0_10 = arith.constant 0 : index
    %c0_11 = arith.constant 0 : index
    %16 = vector.load %arg6[%c0_10, %c0_11] : memref<128x128xbf16, #tpu.memory_space<vmem>>, vector<128x128xbf16>
    %cst_12 = arith.constant dense<0.000000e+00> : vector<16x128xf32>
    %17 = tpu.matmul %15, %16, %cst_12 {dimension_numbers = #tpu.dot_dimension_numbers<[1], [0], [0], [1], [0, 0, 1, 1], [], []>} : vector<16x128xbf16>, vector<128x128xbf16>, vector<16x128xf32> -> vector<16x128xf32>
    %c0_13 = arith.constant 0 : index
    %c0_14 = arith.constant 0 : index
    %18 = vector.load %arg7[%c0_13, %c0_14] : memref<1x128xf32, #tpu.memory_space<vmem>>, vector<1x128xf32>
    %19 = vector.broadcast %18 : vector<1x128xf32> to vector<16x128xf32>
    %20 = arith.addf %17, %19 : vector<16x128xf32>
    %21 = math.tanh %20 : vector<16x128xf32>
    %22 = arith.truncf %21 : vector<16x128xf32> to vector<16x128xbf16>
    %c0_15 = arith.constant 0 : index
    %c0_16 = arith.constant 0 : index
    %23 = vector.load %arg8[%c0_15, %c0_16] : memref<128x128xbf16, #tpu.memory_space<vmem>>, vector<128x128xbf16>
    %cst_17 = arith.constant dense<0.000000e+00> : vector<16x128xf32>
    %24 = tpu.matmul %22, %23, %cst_17 {dimension_numbers = #tpu.dot_dimension_numbers<[1], [0], [0], [1], [0, 0, 1, 1], [], []>} : vector<16x128xbf16>, vector<128x128xbf16>, vector<16x128xf32> -> vector<16x128xf32>
    %c0_18 = arith.constant 0 : index
    %c0_19 = arith.constant 0 : index
    %25 = vector.load %arg9[%c0_18, %c0_19] : memref<1x128xf32, #tpu.memory_space<vmem>>, vector<1x128xf32>
    %26 = vector.broadcast %25 : vector<1x128xf32> to vector<16x128xf32>
    %27 = arith.addf %24, %26 : vector<16x128xf32>
    %28 = math.tanh %27 : vector<16x128xf32>
    %29 = arith.truncf %28 : vector<16x128xf32> to vector<16x128xbf16>
    %c0_20 = arith.constant 0 : index
    %c0_21 = arith.constant 0 : index
    %30 = vector.load %arg10[%c0_20, %c0_21] : memref<128x128xbf16, #tpu.memory_space<vmem>>, vector<128x128xbf16>
    %cst_22 = arith.constant dense<0.000000e+00> : vector<16x128xf32>
    %31 = tpu.matmul %29, %30, %cst_22 {dimension_numbers = #tpu.dot_dimension_numbers<[1], [0], [0], [1], [0, 0, 1, 1], [], []>} : vector<16x128xbf16>, vector<128x128xbf16>, vector<16x128xf32> -> vector<16x128xf32>
    %c0_23 = arith.constant 0 : index
    %c0_24 = arith.constant 0 : index
    %32 = vector.load %arg11[%c0_23, %c0_24] : memref<1x128xf32, #tpu.memory_space<vmem>>, vector<1x128xf32>
    %33 = vector.broadcast %32 : vector<1x128xf32> to vector<16x128xf32>
    %34 = arith.addf %31, %33 : vector<16x128xf32>
    %35 = math.tanh %34 : vector<16x128xf32>
    %36 = arith.truncf %35 : vector<16x128xf32> to vector<16x128xbf16>
    %c0_25 = arith.constant 0 : index
    %c0_26 = arith.constant 0 : index
    %37 = vector.load %arg12[%c0_25, %c0_26] : memref<128x256xbf16, #tpu.memory_space<vmem>>, vector<128x256xbf16>
    %cst_27 = arith.constant dense<0.000000e+00> : vector<16x256xf32>
    %38 = tpu.matmul %36, %37, %cst_27 {dimension_numbers = #tpu.dot_dimension_numbers<[1], [0], [0], [1], [0, 0, 1, 1], [], []>} : vector<16x128xbf16>, vector<128x256xbf16>, vector<16x256xf32> -> vector<16x256xf32>
    %c0_28 = arith.constant 0 : index
    %c0_29 = arith.constant 0 : index
    %39 = vector.load %arg13[%c0_28, %c0_29] : memref<1x256xf32, #tpu.memory_space<vmem>>, vector<1x256xf32>
    %40 = vector.broadcast %39 : vector<1x256xf32> to vector<16x256xf32>
    %41 = arith.addf %38, %40 : vector<16x256xf32>
    %c0_30 = arith.constant 0 : index
    %c0_31 = arith.constant 0 : index
    %42 = vector.load %arg14[%c0_30, %c0_31] : memref<16x256xf32, #tpu.memory_space<vmem>>, vector<16x256xf32>
    tpu.vector_store %arg14[%c0_30, %c0_31], %41 {strides = array<i32>} : memref<16x256xf32, #tpu.memory_space<vmem>>, vector<16x256xf32>,
    return
  }
  func.func @transform_0(%arg0: i32) -> (i32, i32) {
    %c0_i32 = arith.constant 0 : i32
    %c0_i32_0 = arith.constant 0 : i32
    return %arg0, %c0_i32 : i32, i32
  }
  func.func @transform_1(%arg0: i32) -> (i32, i32) {
    %c0_i32 = arith.constant 0 : i32
    %c0_i32_0 = arith.constant 0 : i32
    %c0_i32_1 = arith.constant 0 : i32
    return %c0_i32, %c0_i32_0 : i32, i32
  }
  func.func @transform_2(%arg0: i32) -> (i32, i32) {
    %c0_i32 = arith.constant 0 : i32
    %c0_i32_0 = arith.constant 0 : i32
    %c0_i32_1 = arith.constant 0 : i32
    return %c0_i32, %c0_i32_0 : i32, i32
  }
  func.func @transform_3(%arg0: i32) -> (i32, i32) {
    %c0_i32 = arith.constant 0 : i32
    %c0_i32_0 = arith.constant 0 : i32
    %c0_i32_1 = arith.constant 0 : i32
    return %c0_i32, %c0_i32_0 : i32, i32
  }
  func.func @transform_4(%arg0: i32) -> (i32, i32) {
    %c0_i32 = arith.constant 0 : i32
    %c0_i32_0 = arith.constant 0 : i32
    %c0_i32_1 = arith.constant 0 : i32
    return %c0_i32, %c0_i32_0 : i32, i32
  }
  func.func @transform_5(%arg0: i32) -> (i32, i32) {
    %c0_i32 = arith.constant 0 : i32
    %c0_i32_0 = arith.constant 0 : i32
    %c0_i32_1 = arith.constant 0 : i32
    return %c0_i32, %c0_i32_0 : i32, i32
  }
  func.func @transform_6(%arg0: i32) -> (i32, i32) {
    %c0_i32 = arith.constant 0 : i32
    %c0_i32_0 = arith.constant 0 : i32
    %c0_i32_1 = arith.constant 0 : i32
    return %c0_i32, %c0_i32_0 : i32, i32
  }
  func.func @transform_7(%arg0: i32) -> (i32, i32) {
    %c0_i32 = arith.constant 0 : i32
    %c0_i32_0 = arith.constant 0 : i32
    %c0_i32_1 = arith.constant 0 : i32
    return %c0_i32, %c0_i32_0 : i32, i32
  }
  func.func @transform_8(%arg0: i32) -> (i32, i32) {
    %c0_i32 = arith.constant 0 : i32
    %c0_i32_0 = arith.constant 0 : i32
    %c0_i32_1 = arith.constant 0 : i32
    return %c0_i32, %c0_i32_0 : i32, i32
  }
  func.func @transform_9(%arg0: i32) -> (i32, i32) {
    %c0_i32 = arith.constant 0 : i32
    %c0_i32_0 = arith.constant 0 : i32
    %c0_i32_1 = arith.constant 0 : i32
    return %c0_i32, %c0_i32_0 : i32, i32
  }
  func.func @transform_10(%arg0: i32) -> (i32, i32) {
    %c0_i32 = arith.constant 0 : i32
    %c0_i32_0 = arith.constant 0 : i32
    %c0_i32_1 = arith.constant 0 : i32
    return %c0_i32, %c0_i32_0 : i32, i32
  }
  func.func @transform_11(%arg0: i32) -> (i32, i32) {
    %c0_i32 = arith.constant 0 : i32
    %c0_i32_0 = arith.constant 0 : i32
    %c0_i32_1 = arith.constant 0 : i32
    return %c0_i32, %c0_i32_0 : i32, i32
  }
  func.func @transform_12(%arg0: i32) -> (i32, i32) {
    %c0_i32 = arith.constant 0 : i32
    %c0_i32_0 = arith.constant 0 : i32
    %c0_i32_1 = arith.constant 0 : i32
    return %c0_i32, %c0_i32_0 : i32, i32
  }
  func.func @transform_13(%arg0: i32) -> (i32, i32) {
    %c0_i32 = arith.constant 0 : i32
    %c0_i32_0 = arith.constant 0 : i32
    return %arg0, %c0_i32 : i32, i32
  }
}

</mosaic_0001>

<bundles_post_ra>
// kernel: tpu_custom_call.1
= control target key start
LH: loop header
LB: loop body
LE: loop exit
PB: predicated region body
PF: predicated region fallthrough
CT: control target
= control target key end

     0   :  { %18 = vsyncpa [#allocation3], 0  ;;  %s1732_s0 = inlined_call_operand.hbm [shape: f32[16,256], index: 0, kind: input, shape index: {}]   ;;  %s1733_s1 = inlined_call_operand.hbm [shape: bf16[256,128], index: 1, kind: input, shape index: {}]   ;;  %s1734_s2 = inlined_call_operand.vmem [shape: f32[1,128], index: 2, kind: input, shape index: {}]   ;;  %s1735_s3 = inlined_call_operand.hbm [shape: bf16[128,128], index: 3, kind: input, shape index: {}]   ;;  %s1736_s4 = inlined_call_operand.vmem [shape: f32[1,128], index: 4, kind: input, shape index: {}]   ;;  %s1737_s5 = inlined_call_operand.hbm [shape: bf16[128,128], index: 5, kind: input, shape index: {}]   ;;  %s1738_s6 = inlined_call_operand.vmem [shape: f32[1,128], index: 6, kind: input, shape index: {}]   ;;  %s1739_s7 = inlined_call_operand.hbm [shape: bf16[128,128], index: 7, kind: input, shape index: {}]   ;;  %s1740_s8 = inlined_call_operand.vmem [shape: f32[1,128], index: 8, kind: input, shape index: {}]   ;;  %s1741_s9 = inlined_call_operand.hbm [shape: bf16[128,128], index: 9, kind: input, shape index: {}]   ;;  %s1742_s10 = inlined_call_operand.vmem [shape: f32[1,128], index: 10, kind: input, shape index: {}]   ;;  %s1743_s11 = inlined_call_operand.hbm [shape: bf16[128,256], index: 11, kind: input, shape index: {}]   ;;  %s1744_s12 = inlined_call_operand.vmem [shape: f32[1,256], index: 12, kind: input, shape index: {}]   ;;  %s1745_s13 = inlined_call_operand.hbm [shape: f32[16,256], index: 13, kind: output, shape index: {}]  }
   0x1   :  { %19 = vsyncpa [#allocation6], 0 }
   0x2   :  { %20 = vsyncpa [#allocation9], 0 }
   0x3   :  { %21 = vsyncpa [#allocation12], 0 }
   0x4   :  { %22 = vsyncpa [#allocation4], 0  ;;  %s1463_s25 = smov [#allocation5]   ;;  %s1277_s29 = scalar_lea.hbm %s1733_s1, 2048 }
   0x5   :  { %s40_s26 = sshll.u32 %s1463_s25, 4  ;;  %p1278_p0 = scmp.ne.s32.totalorder %s1733_s1, %s1277_s29  ;;  %s41_s26 = int_to_ptr.vmem [resolvable:$true] %s40_s26 }
   0x6   :  { %p1281_p1 = scmp.lt.u32.totalorder %s1277_s29, %s1733_s1 }
   0x8   :  { %p1283_p2 = pnand %p1281_p1, %p1278_p0 }
   0xa   :  { %1286 = shalt.err (!%p1283_p2)
}
   0xb   :  { %s1287_s17 = scalar_lea.vmem %s41_s26, 2048  ;;  %p1292_p4 = scmp.lt.s32.totalorder %s41_s26, %s41_s26 }
   0xc   :  { %p1288_p3 = scmp.ne.s32.totalorder %s41_s26, %s1287_s17  ;;  %p1293_p5 = scmp.lt.s32.totalorder %s1287_s17, %s1287_s17 }
   0xe   :  { %p1294_p6 = por %p1293_p5, %p1292_p4 }
  0x10   :  { %p1295_p7 = pnand %p1294_p6, %p1288_p3 }
  0x12   :  { %1298 = shalt.err (!%p1295_p7)
}
  0x13   :  { %s1464_s18 = smov 64   ;;  %s1465_s19 = smov 4  }
  0x14   :  { %46 = dma.hbm_to_vmem [thread:$0]  %s1733_s1, 2048, %s41_s26, [#allocation6], %s1464_s18, %s1464_s18, %s1465_s19  }
  0x15   :  { %s1466_s22 = smov [#allocation8]   ;;  %s1467_s24 = smov [#allocation11]  }
  0x16   :  { %s68_s23 = sshll.u32 %s1466_s22, 4  ;;  %s96_s25 = sshll.u32 %s1467_s24, 4  ;;  %s69_s23 = int_to_ptr.vmem [resolvable:$true] %s68_s23  ;;  %s97_s25 = int_to_ptr.vmem [resolvable:$true] %s96_s25 }
  0x17   :  { %s1299_s29 = scalar_lea.hbm %s1737_s5, 1024 }
  0x18   :  { %p1300_p8 = scmp.ne.s32.totalorder %s1737_s5, %s1299_s29  ;;  %p1303_p9 = scmp.lt.u32.totalorder %s1299_s29, %s1737_s5 }
  0x1a   :  { %p1305_p10 = pnand %p1303_p9, %p1300_p8 }
  0x1c   :  { %1308 = shalt.err (!%p1305_p10)
}
  0x1d   :  { %s1309_s1 = scalar_lea.vmem %s69_s23, 1024  ;;  %p1314_p12 = scmp.lt.s32.totalorder %s69_s23, %s69_s23 }
  0x1e   :  { %p1310_p11 = scmp.ne.s32.totalorder %s69_s23, %s1309_s1  ;;  %p1315_p13 = scmp.lt.s32.totalorder %s1309_s1, %s1309_s1 }
  0x20   :  { %p1316_p0 = por %p1315_p13, %p1314_p12 }
  0x22   :  { %p1317_p1 = pnand %p1316_p0, %p1310_p11 }
  0x24   :  { %1320 = shalt.err (!%p1317_p1)
}
  0x25   :  { %74 = dma.hbm_to_vmem [thread:$0]  %s1737_s5, 1024, %s69_s23, [#allocation9], %s1464_s18, %s1464_s18, %s1465_s19  }
  0x26   :  { %s1321_s22 = scalar_lea.hbm %s1741_s9, 1024 }
  0x27   :  { %p1322_p2 = scmp.ne.s32.totalorder %s1741_s9, %s1321_s22  ;;  %p1325_p3 = scmp.lt.u32.totalorder %s1321_s22, %s1741_s9 }
  0x29   :  { %p1327_p4 = pnand %p1325_p3, %p1322_p2 }
  0x2b   :  { %1330 = shalt.err (!%p1327_p4)
}
  0x2c   :  { %s1331_s30 = scalar_lea.vmem %s97_s25, 1024  ;;  %p1336_p6 = scmp.lt.s32.totalorder %s97_s25, %s97_s25 }
  0x2d   :  { %p1332_p5 = scmp.ne.s32.totalorder %s97_s25, %s1331_s30  ;;  %p1337_p7 = scmp.lt.s32.totalorder %s1331_s30, %s1331_s30 }
  0x2f   :  { %p1338_p8 = por %p1337_p7, %p1336_p6 }
  0x31   :  { %p1339_p9 = pnand %p1338_p8, %p1332_p5 }
  0x33   :  { %1342 = shalt.err (!%p1339_p9)
}
  0x34   :  { %102 = dma.hbm_to_vmem [thread:$0]  %s1741_s9, 1024, %s97_s25, [#allocation12], %s1464_s18, %s1464_s18, %s1465_s19  }
  0x35   :  { %s1468_s14 = smov [#allocation2]   ;;  %s1343_s26 = scalar_lea.hbm %s1732_s0, 512 }
  0x36   :  { %s28_s15 = sshll.u32 %s1468_s14, 4  ;;  %p1344_p10 = scmp.ne.s32.totalorder %s1732_s0, %s1343_s26  ;;  %s29_s15 = int_to_ptr.vmem [resolvable:$true] %s28_s15 }
  0x37   :  { %p1347_p11 = scmp.lt.u32.totalorder %s1343_s26, %s1732_s0 }
  0x39   :  { %p1349_p12 = pnand %p1347_p11, %p1344_p10 }
  0x3b   :  { %1352 = shalt.err (!%p1349_p12)
}
  0x3c   :  { %s1353_s24 = scalar_lea.vmem %s29_s15, 512  ;;  %p1358_p0 = scmp.lt.s32.totalorder %s29_s15, %s29_s15 }
  0x3d   :  { %p1354_p13 = scmp.ne.s32.totalorder %s29_s15, %s1353_s24  ;;  %p1359_p1 = scmp.lt.s32.totalorder %s1353_s24, %s1353_s24 }
  0x3f   :  { %p1360_p2 = por %p1359_p1, %p1358_p0 }
  0x41   :  { %p1361_p3 = pnand %p1360_p2, %p1354_p13 }
  0x43   :  { %1364 = shalt.err (!%p1361_p3)
}
  0x44   :  { %s1469_s9 = smov 256   ;;  %s1470_s25 = smov 16  }
  0x45   :  { %34 = dma.hbm_to_vmem [thread:$0]  %s1732_s0, 512, %s29_s15, [#allocation3], %s1469_s9, %s1469_s9, %s1470_s25  }
  0x46   :  { %s1471_s29 = smov [#allocation7]   ;;  %s1472_s5 = smov [#allocation10]  }
  0x47   :  { %s54_s30 = sshll.u32 %s1471_s29, 4  ;;  %s82_s23 = sshll.u32 %s1472_s5, 4  ;;  %s55_s30 = int_to_ptr.vmem [resolvable:$true] %s54_s30  ;;  %s1610_s23 = int_to_ptr.vmem [resolvable:$true] %s82_s23 }
  0x48   :  { %s1365_s1 = scalar_lea.hbm %s1735_s3, 1024 }
  0x49   :  { %p1366_p4 = scmp.ne.s32.totalorder %s1735_s3, %s1365_s1  ;;  %p1369_p5 = scmp.lt.u32.totalorder %s1365_s1, %s1735_s3 }
  0x4b   :  { %p1371_p6 = pnand %p1369_p5, %p1366_p4 }
  0x4d   :  { %1374 = shalt.err (!%p1371_p6)
}
  0x4e   :  { %s1375_s0 = scalar_lea.vmem %s55_s30, 1024  ;;  %p1380_p8 = scmp.lt.s32.totalorder %s55_s30, %s55_s30 }
  0x4f   :  { %p1376_p7 = scmp.ne.s32.totalorder %s55_s30, %s1375_s0  ;;  %p1381_p9 = scmp.lt.s32.totalorder %s1375_s0, %s1375_s0 }
  0x51   :  { %p1382_p10 = por %p1381_p9, %p1380_p8 }
  0x53   :  { %p1383_p11 = pnand %p1382_p10, %p1376_p7 }
  0x55   :  { %1386 = shalt.err (!%p1383_p11)
}
  0x56   :  { %60 = dma.hbm_to_vmem [thread:$0]  %s1735_s3, 1024, %s55_s30, [#allocation6], %s1464_s18, %s1464_s18, %s1465_s19  }
  0x57   :  { %s1387_s28 = scalar_lea.hbm %s1739_s7, 1024 }
  0x58   :  { %p1388_p12 = scmp.ne.s32.totalorder %s1739_s7, %s1387_s28  ;;  %p1391_p13 = scmp.lt.u32.totalorder %s1387_s28, %s1739_s7 }
  0x5a   :  { %p1393_p0 = pnand %p1391_p13, %p1388_p12 }
  0x5c   :  { %1396 = shalt.err (!%p1393_p0)
}
  0x5d   :  { %s1397_s1 = scalar_lea.vmem %s1610_s23, 1024  ;;  %p1402_p2 = scmp.lt.s32.totalorder %s1610_s23, %s1610_s23 }
  0x5e   :  { %p1398_p1 = scmp.ne.s32.totalorder %s1610_s23, %s1397_s1  ;;  %p1403_p3 = scmp.lt.s32.totalorder %s1397_s1, %s1397_s1 }
  0x60   :  { %p1404_p4 = por %p1403_p3, %p1402_p2 }
  0x62   :  { %p1405_p5 = pnand %p1404_p4, %p1398_p1 }
  0x64   :  { %1408 = shalt.err (!%p1405_p5)
}
  0x65   :  { %88 = dma.hbm_to_vmem [thread:$0]  %s1739_s7, 1024, %s1610_s23, [#allocation9], %s1464_s18, %s1464_s18, %s1465_s19  }
  0x66   :  { %s1473_s26 = smov [#allocation13]   ;;  %s1409_s0 = scalar_lea.hbm %s1743_s11, 2048 }
  0x67   :  { %s110_s17 = sshll.u32 %s1473_s26, 4  ;;  %p1410_p6 = scmp.ne.s32.totalorder %s1743_s11, %s1409_s0  ;;  %s111_s17 = int_to_ptr.vmem [resolvable:$true] %s110_s17 }
  0x68   :  { %p1413_p7 = scmp.lt.u32.totalorder %s1409_s0, %s1743_s11 }
  0x6a   :  { %p1415_p8 = pnand %p1413_p7, %p1410_p6 }
  0x6c   :  { %1418 = shalt.err (!%p1415_p8)
}
  0x6d   :  { %s1419_s28 = scalar_lea.vmem %s111_s17, 2048  ;;  %p1424_p10 = scmp.lt.s32.totalorder %s111_s17, %s111_s17 }
  0x6e   :  { %p1420_p9 = scmp.ne.s32.totalorder %s111_s17, %s1419_s28  ;;  %p1425_p11 = scmp.lt.s32.totalorder %s1419_s28, %s1419_s28 }
  0x70   :  { %p1426_p12 = por %p1425_p11, %p1424_p10 }
  0x72   :  { %p1427_p13 = pnand %p1426_p12, %p1420_p9 }
  0x74   :  { %1430 = shalt.err (!%p1427_p13)
}
  0x75   :  { %s1474_s7 = smov 128   ;;  %s1475_s18 = smov 8  }
  0x76   :  { %116 = dma.hbm_to_vmem [thread:$0]  %s1743_s11, 2048, %s111_s17, [#allocation12], %s1474_s7, %s1474_s7, %s1475_s18  }
  0x77   :  { %1453 = dma.done.wait [#allocation3], 512  }
  0x78   :  { %1454 = vsyncadd [#allocation3], 4294966784 }
  0x79   :  { %1455 = dma.done.wait [#allocation6], 3072  }
  0x7a   :  { %1456 = vsyncadd [#allocation6], 4294964224 }
  0x7b   :  { %1457 = dma.done.wait [#allocation9], 2048  }
  0x7c   :  { %1458 = vsyncadd [#allocation9], 4294965248 }
  0x7d   :  { %1459 = dma.done.wait [#allocation12], 3072  }
  0x7e   :  { %1460 = vsyncadd [#allocation12], 4294964224  ;;  %v1476_v0 = vmov 0.0   ;;  %v1185_v1 = vld [vmem:[#allocation5 + $0x40] sm:$0xff]   ;;  %v1187_v3 = vld [vmem:[#allocation5 + $0x48] sm:$0xff]   ;;  %vm1477_vm0 = vmmov 0  }
  0x7f   :  { %1088 = vmatprep.subr.bf16.mxu1 %v1476_v0  ;;  %v1186_v2 = vld [vmem:[#allocation5] sm:$0xff]   ;;  %1030 = vmatprep.subr.bf16.mxu0 %v1185_v1  ;;  %v1188_v4 = vld [vmem:[#allocation5 + $0x8] sm:$0xff]   ;;  %v1189_v5 = vld [vmem:[#allocation5 + $0x50] sm:$0xff]  }
  0x80   :  { %1031 = vmatpush3.bf16.msra.mxu0 %v1186_v2  ;;  %v1190_v6 = vld [vmem:[#allocation5 + $0x10] sm:$0xff]   ;;  %v1191_v7 = vld [vmem:[#allocation5 + $0x58] sm:$0xff]   ;;  %v1193_v9 = vld [vmem:[#allocation5 + $0x60] sm:$0xff]   ;;  %1104 = vmatprep.mubr.msk.bf16.mxu1 %vm1477_vm0, %v1476_v0 }
  0x81   :  { %1032 = vmatprep.subr.bf16.mxu0 %v1187_v3  ;;  %v1192_v8 = vld [vmem:[#allocation5 + $0x18] sm:$0xff]   ;;  %v1194_v10 = vld [vmem:[#allocation5 + $0x20] sm:$0xff]   ;;  %v1195_v11 = vld [vmem:[#allocation5 + $0x68] sm:$0xff]  }
  0x82   :  { %v142_v12 = vld [vmem:[#allocation2 + $0x8] sm:$0xff]  ;;  %v144_v13 = vld [vmem:[#allocation2 + $0x18] sm:$0xff]  ;;  %v1201_v16 = vld [vmem:[#allocation7] sm:$0xff]  }
  0x83   :  { %v1196_v14 = vld [vmem:[#allocation5 + $0x28] sm:$0xff]   ;;  %v146_v15 = vpack.c.bf16 %v144_v13, %v142_v12  ;;  %v1197_v17 = vld [vmem:[#allocation5 + $0x70] sm:$0xff]   ;;  %1089 = vmatpush3.bf16.msra.mxu1 %v1201_v16  ;;  %v1199_v20 = vld [vmem:[#allocation5 + $0x78] sm:$0xff]  }
  0x84   :  { %1033 = vmatpush3.bf16.msra.mxu0 %v1188_v4  ;;  %v1202_v18 = vld [vmem:[#allocation7 + $0x8] sm:$0xff]   ;;  %v1198_v19 = vld [vmem:[#allocation5 + $0x30] sm:$0xff]   ;;  %1090 = vmatprep.subr.bf16.mxu1 %v1476_v0  ;;  %v1200_v22 = vld [vmem:[#allocation5 + $0x38] sm:$0xff]  }
  0x85   :  { %1034 = vmatprep.subr.bf16.mxu0 %v1189_v5  ;;  %314 = vmatprep.mubr.bf16.mxu0 %v146_v15  ;;  %v1203_v21 = vld [vmem:[#allocation7 + $0x10] sm:$0xff]   ;;  %v141_v23 = vld [vmem:[#allocation2] sm:$0xff]  ;;  %v1204_v26 = vld [vmem:[#allocation7 + $0x18] sm:$0xff]  }
  0x86   :  { %v143_v24 = vld [vmem:[#allocation2 + $0x10] sm:$0xff]  ;;  %v1205_v27 = vld [vmem:[#allocation7 + $0x20] sm:$0xff]   ;;  %v1206_v28 = vld [vmem:[#allocation7 + $0x28] sm:$0xff]  }
  0x87   :  { %1091 = vmatpush3.bf16.msra.mxu1 %v1202_v18  ;;  %v145_v25 = vpack.c.bf16 %v143_v24, %v141_v23  ;;  %v1207_v29 = vld [vmem:[#allocation7 + $0x30] sm:$0xff]   ;;  %v1208_v30 = vld [vmem:[#allocation7 + $0x38] sm:$0xff]   ;;  %v1209_v31 = vld [vmem:[#allocation8] sm:$0xff]  }
  0x88   :  { %1035 = vmatpush3.bf16.msra.mxu0 %v1190_v6  ;;  %1092 = vmatprep.subr.bf16.mxu1 %v1476_v0  ;;  %v1210_v32 = vld [vmem:[#allocation8 + $0x8] sm:$0xff]   ;;  %v1211_v33 = vld [vmem:[#allocation8 + $0x10] sm:$0xff]   ;;  %v1212_v34 = vld [vmem:[#allocation8 + $0x18] sm:$0xff]  }
  0x89   :  { %1036 = vmatprep.subr.bf16.mxu0 %v1191_v7  ;;  %v961_v36 = vld [vmem:[%s1734_s2] ss:$0 sm:$0xff]  ;;  %v1214_v48 = vld [vmem:[#allocation8 + $0x28] sm:$0xff]   ;;  %v1215_v49 = vld [vmem:[#allocation8 + $0x30] sm:$0xff]  }
  0x8a   :  { %v1213_v47 = vld [vmem:[#allocation8 + $0x20] sm:$0xff]   ;;  %v1216_v50 = vld [vmem:[#allocation8 + $0x38] sm:$0xff]   ;;  %v1218_v52 = vld [vmem:[#allocation10 + $0x8] sm:$0xff]  }
  0x8b   :  { %1093 = vmatpush3.bf16.msra.mxu1 %v1203_v21  ;;  %v1217_v51 = vld [vmem:[#allocation10] sm:$0xff]   ;;  %v1219_v53 = vld [vmem:[#allocation10 + $0x10] sm:$0xff]   ;;  %v1220_v54 = vld [vmem:[#allocation10 + $0x18] sm:$0xff]  }
  0x8c   :  { %1037 = vmatpush3.bf16.msra.mxu0 %v1192_v8  ;;  %1094 = vmatprep.subr.bf16.mxu1 %v1476_v0  ;;  %v978_v55 = vld [vmem:[%s1736_s4] ss:$0 sm:$0xff]  ;;  %v1222_v3 = vld [vmem:[#allocation10 + $0x28] sm:$0xff]   ;;  %v1223_v4 = vld [vmem:[#allocation10 + $0x30] sm:$0xff]  }
  0x8d   :  { %1038 = vmatprep.subr.bf16.mxu0 %v1193_v9  ;;  %v1221_v2 = vld [vmem:[#allocation10 + $0x20] sm:$0xff]   ;;  %v1224_v5 = vld [vmem:[#allocation10 + $0x38] sm:$0xff]   ;;  %v1226_v7 = vld [vmem:[#allocation11 + $0x8] sm:$0xff]  }
  0x8e   :  { %v1225_v6 = vld [vmem:[#allocation11] sm:$0xff]   ;;  %v1227_v8 = vld [vmem:[#allocation11 + $0x10] sm:$0xff]   ;;  %v1228_v9 = vld [vmem:[#allocation11 + $0x18] sm:$0xff]  }
  0x8f   :  { %1095 = vmatpush3.bf16.msra.mxu1 %v1204_v26  ;;  %v1230_v21 = vld [vmem:[#allocation11 + $0x28] sm:$0xff]   ;;  %v1232_v23 = vld [vmem:[#allocation11 + $0x38] sm:$0xff]  }
  0x90   :  { %1039 = vmatpush3.bf16.msra.mxu0 %v1194_v10  ;;  %1096 = vmatprep.subr.bf16.mxu1 %v1476_v0  ;;  %v987_v10 = vld [vmem:[%s1738_s6] ss:$0 sm:$0xff]  ;;  %v1238_v26 = vld [vmem:[#allocation13 + $0x14] ss:$8 sps:$4 sm:$0xff]  }
  0x91   :  { %1040 = vmatprep.subr.bf16.mxu0 %v1195_v11  ;;  %v1233_v24 = vld [vmem:[#allocation13] ss:$8 sps:$4 sm:$0xff]  }
  0x93   :  { %1097 = vmatpush3.bf16.msra.mxu1 %v1205_v27  ;;  %v1236_v27 = vld [vmem:[#allocation13 + $0x10] ss:$8 sps:$4 sm:$0xff]  }
  0x94   :  { %1041 = vmatpush3.bf16.msra.mxu0 %v1196_v14  ;;  %1098 = vmatprep.subr.bf16.mxu1 %v1476_v0 }
  0x95   :  { %1042 = vmatprep.subr.bf16.mxu0 %v1197_v17 }
  0x97   :  { %1099 = vmatpush3.bf16.msra.mxu1 %v1206_v28  ;;  %v1241_v28 = vld [vmem:[#allocation13 + $0x24] ss:$8 sps:$4 sm:$0xff]  }
  0x98   :  { %1043 = vmatpush3.bf16.msra.mxu0 %v1198_v19  ;;  %1100 = vmatprep.subr.bf16.mxu1 %v1476_v0 }
  0x99   :  { %1044 = vmatprep.subr.bf16.mxu0 %v1199_v20  ;;  %v1229_v20 = vld [vmem:[#allocation11 + $0x20] sm:$0xff]  }
  0x9b   :  { %1101 = vmatpush3.bf16.msra.mxu1 %v1207_v29  ;;  %v1239_v29 = vld [vmem:[#allocation13 + $0x20] ss:$8 sps:$4 sm:$0xff]  }
  0x9c   :  { %1045 = vmatpush3.bf16.msra.mxu0 %v1200_v22  ;;  %1102 = vmatprep.subr.bf16.mxu1 %v1476_v0  ;;  %v1231_v22 = vld [vmem:[#allocation11 + $0x30] sm:$0xff]  }
  0x9d   :  { %1108 = vmatprep.subr.bf16.mxu0 %v1476_v0 }
  0x9f   :  { %315 = vmatmul.mubr.bf16.vlgmr.msra.gmra.mrb[0].mxu0 %v145_v25  ;;  %1103 = vmatpush3.bf16.msra.mxu1 %v1208_v30  ;;  %v1235_v25 = vld [vmem:[#allocation13 + $0x4] ss:$8 sps:$4 sm:$0xff]   ;;  %v1244_v30 = vld [vmem:[#allocation13 + $0x34] ss:$8 sps:$4 sm:$0xff]  }
  0xa0   :  { %1124 = vmatprep.mubr.msk.bf16.mxu0 %vm1477_vm0, %v1476_v0  ;;  %1128 = vmatprep.subr.bf16.mxu1 %v1476_v0 }
  0xa1   :  { %1109 = vmatpush3.bf16.msra.mxu0 %v1209_v31  ;;  %v1242_v31 = vld [vmem:[#allocation13 + $0x30] ss:$8 sps:$4 sm:$0xff]  }
  0xa2   :  { %1110 = vmatprep.subr.bf16.mxu0 %v1476_v0 }
  0xa5   :  { %1111 = vmatpush3.bf16.msra.mxu0 %v1210_v32 }
  0xa6   :  { %1112 = vmatprep.subr.bf16.mxu0 %v1476_v0 }
  0xa9   :  { %1113 = vmatpush3.bf16.msra.mxu0 %v1211_v33 }
  0xaa   :  { %1114 = vmatprep.subr.bf16.mxu0 %v1476_v0 }
  0xad   :  { %1115 = vmatpush3.bf16.msra.mxu0 %v1212_v34 }
  0xae   :  { %1116 = vmatprep.subr.bf16.mxu0 %v1476_v0 }
  0xb1   :  { %1117 = vmatpush3.bf16.msra.mxu0 %v1213_v47  ;;  %v1478_v47 = vmov 0  }
  0xb2   :  { %1118 = vmatprep.subr.bf16.mxu0 %v1476_v0 }
  0xb5   :  { %1119 = vmatpush3.bf16.msra.mxu0 %v1214_v48  ;;  %v1256_v48 = vld [vmem:[#allocation13 + $0x74] ss:$8 sps:$4 sm:$0xff]  }
  0xb6   :  { %1120 = vmatprep.subr.bf16.mxu0 %v1476_v0 }
  0xb9   :  { %1121 = vmatpush3.bf16.msra.mxu0 %v1215_v49  ;;  %v1254_v49 = vld [vmem:[#allocation13 + $0x70] ss:$8 sps:$4 sm:$0xff]  }
  0xba   :  { %1122 = vmatprep.subr.bf16.mxu0 %v1476_v0 }
  0xbd   :  { %1123 = vmatpush3.bf16.msra.mxu0 %v1216_v50  ;;  %v1005_v50 = vld [vmem:[%s1742_s10] ss:$0 sm:$0xff]  ;;  %s1479_s10 = smov [#allocation14]  }
  0xbe   :  { %1148 = vmatprep.subr.bf16.mxu0 %v1476_v0  ;;  %s946_s26 = sshll.u32 %s1479_s10, 4  ;;  %s947_s26 = int_to_ptr.vmem [resolvable:$true] %s946_s26 }
  0xbf   :  { %s1431_s17 = scalar_lea.vmem %s947_s26, 512  ;;  %p1436_p1 = scmp.lt.s32.totalorder %s947_s26, %s947_s26 }
  0xc0   :  { %p1432_p0 = scmp.ne.s32.totalorder %s947_s26, %s1431_s17  ;;  %p1437_p2 = scmp.lt.s32.totalorder %s1431_s17, %s1431_s17 }
  0xc2   :  { %p1438_p3 = por %p1437_p2, %p1436_p1 }
  0xc4   :  { %p1439_p4 = pnand %p1438_p3, %p1432_p0 }
 0x172   :  { %v1046_v35 = vpop.f32.mrb[0].mxu0 }
 0x173   :  { %v1047_v37 = vpop.f32.mrb[1].mxu0 }
 0x174   :  { %v1048_v38 = vadd.f32 %v1047_v37, %v1046_v35  ;;  %v1049_v39 = vpop.f32.mrb[2].mxu0 }
 0x175   :  { %v1050_v40 = vpop.f32.mrb[3].mxu0 }
 0x176   :  { %v317_v41 = vadd.f32 %v1048_v38, %v961_v36  ;;  %v1051_v42 = vadd.f32 %v1050_v40, %v1049_v39 }
 0x178   :  { %v320_v43 = vadd.f32 %v1051_v42, %v961_v36  ;;  %1257 = vtanh.f32 %v317_v41  ;;  %v1247_v41 = vld [vmem:[#allocation13 + $0x44] ss:$8 sps:$4 sm:$0xff]   ;;  %v1245_v42 = vld [vmem:[#allocation13 + $0x40] ss:$8 sps:$4 sm:$0xff]  }
 0x17a   :  { %1259 = vtanh.f32 %v320_v43  ;;  %v1250_v43 = vld [vmem:[#allocation13 + $0x54] ss:$8 sps:$4 sm:$0xff]  }
 0x182   :  { %v1258_v44 = vpop.eup %1257 }
 0x184   :  { %v1260_v45 = vpop.eup %1259 }
 0x185   :  { %v325_v46 = vpack.c.bf16 %v1260_v45, %v1258_v44  ;;  %v1248_v44 = vld [vmem:[#allocation13 + $0x50] ss:$8 sps:$4 sm:$0xff]   ;;  %v1253_v45 = vld [vmem:[#allocation13 + $0x64] ss:$8 sps:$4 sm:$0xff]  }
 0x187   :  { %1105 = vmatmul.mubr.bf16.vlgmr.msra.gmra.mrb[0].mxu1 %v325_v46  ;;  %v1251_v46 = vld [vmem:[#allocation13 + $0x60] ss:$8 sps:$4 sm:$0xff]  }
 0x188   :  { %1144 = vmatprep.mubr.msk.bf16.mxu1 %vm1477_vm0, %v1476_v0  ;;  %1129 = vmatpush3.bf16.msra.mxu1 %v1217_v51 }
 0x189   :  { %1130 = vmatprep.subr.bf16.mxu1 %v1476_v0 }
 0x18c   :  { %1131 = vmatpush3.bf16.msra.mxu1 %v1218_v52 }
 0x18d   :  { %1132 = vmatprep.subr.bf16.mxu1 %v1476_v0 }
 0x190   :  { %1133 = vmatpush3.bf16.msra.mxu1 %v1219_v53 }
 0x191   :  { %1134 = vmatprep.subr.bf16.mxu1 %v1476_v0 }
 0x194   :  { %1135 = vmatpush3.bf16.msra.mxu1 %v1220_v54 }
 0x195   :  { %1136 = vmatprep.subr.bf16.mxu1 %v1476_v0 }
 0x198   :  { %1137 = vmatpush3.bf16.msra.mxu1 %v1221_v2 }
 0x199   :  { %1138 = vmatprep.subr.bf16.mxu1 %v1476_v0 }
 0x19c   :  { %1139 = vmatpush3.bf16.msra.mxu1 %v1222_v3 }
 0x19d   :  { %1140 = vmatprep.subr.bf16.mxu1 %v1476_v0 }
 0x1a0   :  { %1141 = vmatpush3.bf16.msra.mxu1 %v1223_v4 }
 0x1a1   :  { %1142 = vmatprep.subr.bf16.mxu1 %v1476_v0 }
 0x1a4   :  { %1143 = vmatpush3.bf16.msra.mxu1 %v1224_v5 }
 0x1a5   :  { %894 = vmatprep.subr.bf16.mxu1 %v1235_v25 }
 0x25a   :  { %v431_v56 = vpop.f32.mrb[0].mxu1 }
 0x25b   :  { %v432_v57 = vadd.f32 %v978_v55, %v431_v56  ;;  %v1106_v58 = vpop.f32.mrb[1].mxu1 }
 0x25c   :  { %v434_v59 = vpop.f32.mrb[2].mxu1 }
 0x25d   :  { %v435_v60 = vadd.f32 %v978_v55, %v434_v59  ;;  %v1107_v61 = vpop.f32.mrb[3].mxu1  ;;  %1261 = vtanh.f32 %v432_v57 }
 0x25f   :  { %1263 = vtanh.f32 %v435_v60  ;;  %v804_v60 = vlaneseq }
 0x261   :  { %v805_v61 = vshrl.u32 %v804_v60, 7 }
 0x267   :  { %v1262_v62 = vpop.eup %1261 }
 0x269   :  { %v1264_v63 = vpop.eup %1263 }
 0x26a   :  { %v440_v1 = vpack.c.bf16 %v1264_v63, %v1262_v62  ;;  %v806_v62 = vsub.s32 0, %v805_v61  ;;  %v802_v63 = vld [vmem:[%s1744_s12] sm:$0x3] }
 0x26c   :  { %1125 = vmatmul.mubr.bf16.vlgmr.msra.gmra.mrb[4].mxu0 %v440_v1  ;;  %v810_v1 = vsub.s32 1, %v805_v61  ;;  %v807_v2 = vrot.slane %v802_v63, %v806_v62 }
 0x26d   :  { %1164 = vmatprep.mubr.msk.bf16.mxu0 %vm1477_vm0, %v1476_v0  ;;  %1149 = vmatpush3.bf16.msra.mxu0 %v1225_v6 }
 0x26e   :  { %1150 = vmatprep.subr.bf16.mxu0 %v1476_v0  ;;  %v811_v3 = vrot.slane %v802_v63, %v810_v1 }
 0x271   :  { %1151 = vmatpush3.bf16.msra.mxu0 %v1226_v7 }
 0x272   :  { %1152 = vmatprep.subr.bf16.mxu0 %v1476_v0 }
 0x275   :  { %1153 = vmatpush3.bf16.msra.mxu0 %v1227_v8 }
 0x276   :  { %1154 = vmatprep.subr.bf16.mxu0 %v1476_v0 }
 0x279   :  { %1155 = vmatpush3.bf16.msra.mxu0 %v1228_v9 }
 0x27a   :  { %1156 = vmatprep.subr.bf16.mxu0 %v1476_v0 }
 0x27d   :  { %1157 = vmatpush3.bf16.msra.mxu0 %v1229_v20 }
 0x27e   :  { %1158 = vmatprep.subr.bf16.mxu0 %v1476_v0 }
 0x281   :  { %1159 = vmatpush3.bf16.msra.mxu0 %v1230_v21 }
 0x282   :  { %1160 = vmatprep.subr.bf16.mxu0 %v1476_v0 }
 0x285   :  { %1161 = vmatpush3.bf16.msra.mxu0 %v1231_v22 }
 0x286   :  { %1162 = vmatprep.subr.bf16.mxu0 %v1476_v0  ;;  %v996_v0 = vld [vmem:[%s1740_s8] ss:$0 sm:$0xff] }
 0x289   :  { %1163 = vmatpush3.bf16.msra.mxu0 %v1232_v23 }
 0x33f   :  { %v546_v11 = vpop.f32.mrb[4].mxu0 }
 0x340   :  { %v547_v12 = vadd.f32 %v987_v10, %v546_v11  ;;  %v1126_v13 = vpop.f32.mrb[5].mxu0 }
 0x341   :  { %v549_v14 = vpop.f32.mrb[6].mxu0 }
 0x342   :  { %v550_v15 = vadd.f32 %v987_v10, %v549_v14  ;;  %v1127_v16 = vpop.f32.mrb[7].mxu0  ;;  %1265 = vtanh.f32 %v547_v12 }
 0x344   :  { %1267 = vtanh.f32 %v550_v15 }
 0x34c   :  { %v1266_v17 = vpop.eup %1265 }
 0x34e   :  { %v1268_v18 = vpop.eup %1267 }
 0x34f   :  { %v555_v19 = vpack.c.bf16 %v1268_v18, %v1266_v17 }
 0x351   :  { %1145 = vmatmul.mubr.bf16.vlgmr.msra.gmra.mrb[4].mxu1 %v555_v19 }
 0x352   :  { %895 = vmatpush1.bf16.msra.mxu1 %v1233_v24  ;;  %926 = vmatprep.mubr.bf16.mxu1 %v1478_v47 }
 0x353   :  { %896 = vmatprep.subr.bf16.mxu1 %v1238_v26 }
 0x356   :  { %897 = vmatpush1.bf16.msra.mxu1 %v1236_v27 }
 0x357   :  { %898 = vmatprep.subr.bf16.mxu1 %v1241_v28 }
 0x35a   :  { %899 = vmatpush1.bf16.msra.mxu1 %v1239_v29 }
 0x35b   :  { %900 = vmatprep.subr.bf16.mxu1 %v1244_v30 }
 0x35e   :  { %901 = vmatpush1.bf16.msra.mxu1 %v1242_v31 }
 0x35f   :  { %902 = vmatprep.subr.bf16.mxu1 %v1247_v41 }
 0x362   :  { %903 = vmatpush1.bf16.msra.mxu1 %v1245_v42 }
 0x363   :  { %904 = vmatprep.subr.bf16.mxu1 %v1250_v43 }
 0x366   :  { %905 = vmatpush1.bf16.msra.mxu1 %v1248_v44 }
 0x367   :  { %906 = vmatprep.subr.bf16.mxu1 %v1253_v45 }
 0x36a   :  { %907 = vmatpush1.bf16.msra.mxu1 %v1251_v46 }
 0x36b   :  { %908 = vmatprep.subr.bf16.mxu1 %v1256_v48 }
 0x36e   :  { %909 = vmatpush1.bf16.msra.mxu1 %v1254_v49 }
 0x424   :  { %v661_v32 = vpop.f32.mrb[4].mxu1 }
 0x425   :  { %v662_v33 = vadd.f32 %v996_v0, %v661_v32  ;;  %v1146_v34 = vpop.f32.mrb[5].mxu1 }
 0x426   :  { %v664_v35 = vpop.f32.mrb[6].mxu1 }
 0x427   :  { %v665_v36 = vadd.f32 %v996_v0, %v664_v35  ;;  %v1147_v37 = vpop.f32.mrb[7].mxu1  ;;  %1269 = vtanh.f32 %v662_v33 }
 0x429   :  { %1271 = vtanh.f32 %v665_v36 }
 0x431   :  { %v1270_v38 = vpop.eup %1269 }
 0x433   :  { %v1272_v39 = vpop.eup %1271 }
 0x434   :  { %v670_v40 = vpack.c.bf16 %v1272_v39, %v1270_v38 }
 0x436   :  { %1165 = vmatmul.mubr.bf16.vlgmr.msra.gmra.mrb[8].mxu0 %v670_v40 }
 0x509   :  { %v776_v51 = vpop.f32.mrb[8].mxu0 }
 0x50a   :  { %v777_v52 = vadd.f32 %v1005_v50, %v776_v51  ;;  %v1166_v53 = vpop.f32.mrb[9].mxu0 }
 0x50b   :  { %v779_v54 = vpop.f32.mrb[10].mxu0 }
 0x50c   :  { %v780_v55 = vadd.f32 %v1005_v50, %v779_v54  ;;  %v1167_v56 = vpop.f32.mrb[11].mxu0  ;;  %1273 = vtanh.f32 %v777_v52 }
 0x50e   :  { %1275 = vtanh.f32 %v780_v55 }
 0x516   :  { %v1274_v57 = vpop.eup %1273 }
 0x518   :  { %v1276_v58 = vpop.eup %1275 }
 0x519   :  { %v785_v59 = vpack.c.bf16 %v1276_v58, %v1274_v57 }
 0x51b   :  { %927 = vmatmul.mubr.bf16.vlgmr.msra.gmra.mrb[8].mxu1 %v785_v59 }
 0x5ee   :  { %v928_v4 = vpop.f32.mrb[8].mxu1 }
 0x5ef   :  { %v929_v5 = vadd.f32 %v928_v4, %v807_v2  ;;  %v930_v6 = vpop.f32.mrb[9].mxu1 }
 0x5f0   :  { %v931_v7 = vadd.f32 %v930_v6, %v811_v3  ;;  %v932_v8 = vpop.f32.mrb[10].mxu1 }
 0x5f1   :  { %937 = vst [vmem:[#allocation14] sm:$0xff] %v929_v5  ;;  %v933_v9 = vadd.f32 %v932_v8, %v807_v2  ;;  %v934_v10 = vpop.f32.mrb[11].mxu1 }
 0x5f2   :  { %938 = vst [vmem:[#allocation14 + $0x8] sm:$0xff] %v931_v7  ;;  %v935_v11 = vadd.f32 %v934_v10, %v811_v3 }
 0x5f3   :  { %939 = vst [vmem:[#allocation14 + $0x10] sm:$0xff] %v933_v9 }
 0x5f4   :  { %940 = vst [vmem:[#allocation14 + $0x18] sm:$0xff] %v935_v11 }
 0x5f5   :  { %1442 = shalt.err (!%p1439_p4)
}
 0x5f6   :  { %s1443_s21 = scalar_lea.hbm %s1745_s13, 512 }
 0x5f7   :  { %p1444_p5 = scmp.ne.s32.totalorder %s1745_s13, %s1443_s21  ;;  %p1447_p6 = scmp.lt.u32.totalorder %s1443_s21, %s1745_s13 }
 0x5f9   :  { %p1449_p7 = pnand %p1447_p6, %p1444_p5 }
 0x5fb   :  { %1452 = shalt.err (!%p1449_p7)
}
 0x5fc   :  { %952 = dma.vmem_to_hbm [thread:$0]  %s947_s26, 512, %s1745_s13, [#allocation4], %s1469_s9, %s1469_s9, %s1470_s25  }
 0x5fd   :  { %1461 = dma.done.wait [#allocation4], 512  }
 0x5fe   :  { %1462 = vsyncadd [#allocation4], 4294966784 }
 0x5ff   :  { %956 = vsyncpa [#allocation3], 1 }
 0x600   :  { %957 = vsyncpa [#allocation6], 1 }
 0x601   :  { %958 = vsyncpa [#allocation9], 1 }
 0x602   :  { %959 = vsyncpa [#allocation12], 1 }
 0x603   :  { %960 = vsyncpa [#allocation4], 1 }

</bundles_post_ra>
